<compile_context>
chip_gen: v7x
topology: tpu7x:2x2x1
jax: 0.10.0
libtpu: 0.0.40
codegen_flags: <defaults>
</compile_context>

<pallas_src>
from functools import partial

import jax
import jax.numpy as jnp
from jax.experimental import pallas as pl
from jax.experimental.pallas import tpu as pltpu

# ---- model hyper-parameters (mirroring ECL_model.__init__ defaults) ---------
OUTPUT_DIM = 8          # output_dim
TEMPERATURE = 0.01      # temperature
NUM_CLASSES = 10        # dataset='mnist'
HIDDEN = 32             # backbone hidden width (backbone is user-supplied; see TODO)


def _round_up(n: int, m: int) -> int:
    return ((n + m - 1) // m) * m


def _cdiv(a: int, b: int) -> int:
    return (a + b - 1) // b


# --------------------------------------------------------------------------- #
# Kernel
# --------------------------------------------------------------------------- #
def ecl_kernel(x_ref, w1_ref, b1_ref, w2_ref, b2_ref, pt_ref, psq_ref, o_ref,
               *, neg_inv_temp: float):
    """One batch tile: MLP backbone -> -||e - p|| / temperature.

    x_ref  : (tileB, Din)   f32   (streamed; cast to bf16 in-kernel)
    w1_ref : (Din,  H_p)    bf16  b1_ref : (1, H_p)  f32
    w2_ref : (H_p,  D_p)    bf16  b2_ref : (1, D_p)  f32
    pt_ref : (D_p,  K_p)    f32   (prototypes, transposed)
    psq_ref: (1,    K_p)    f32   (precomputed ||p||^2 per class)
    o_ref  : (tileB, K_p)   f32
    """
    # ---- backbone (self.model stand-in): Linear -> ReLU -> Linear ----
    x = x_ref[...].astype(jnp.bfloat16)            # single cast, on the VPU
    h = jnp.dot(x, w1_ref[...], preferred_element_type=jnp.float32)
    h = jnp.maximum(h + b1_ref[...], 0.0)
    e = jnp.dot(h.astype(jnp.bfloat16), w2_ref[...],
                preferred_element_type=jnp.float32) + b2_ref[...]   # (tileB, D_p) f32

    # ---- -||e - p|| / temperature via ||e||^2 + ||p||^2 - 2 e.p ----
    # f32 cross matmul is fine while D_p, K_p <= 128; cast to bf16 if K grows.
    e_sq = jnp.sum(e * e, axis=-1, keepdims=True)                         # (tileB, 1)
    cross = jnp.dot(e, pt_ref[...], preferred_element_type=jnp.float32)   # (tileB, K_p)
    d2 = jnp.maximum(e_sq + psq_ref[...] - 2.0 * cross, 0.0)              # clamp fp rounding
    # TODO(synk): if this path is ever differentiated, add a small eps before sqrt.
    o_ref[...] = (jnp.sqrt(d2) * neg_inv_temp).astype(o_ref.dtype)


# --------------------------------------------------------------------------- #
# Parameter preparation (runs once, not per forward call)
# --------------------------------------------------------------------------- #
def prepare_params(w1, b1, w2, b2, prototypes):
    """Pad/cast the static parameters ONCE (hoisted out of the per-call path).

    hid / d_out / K are zero-padded to lane-dense multiples of 128; the padding
    is mathematically transparent (zero rows/cols contribute nothing)."""
    d_in, hid = w1.shape
    d_out = w2.shape[1]
    num_classes = prototypes.shape[0]
    hid_p = _round_up(hid, 128)
    d_out_p = _round_up(d_out, 128)
    k_p = _round_up(num_classes, 128)

    w1_p = jnp.zeros((d_in, hid_p), jnp.bfloat16).at[:, :hid].set(w1.astype(jnp.bfloat16))
    b1_p = jnp.zeros((1, hid_p), jnp.float32).at[0, :hid].set(b1.astype(jnp.float32))
    w2_p = jnp.zeros((hid_p, d_out_p), jnp.bfloat16).at[:hid, :d_out].set(w2.astype(jnp.bfloat16))
    b2_p = jnp.zeros((1, d_out_p), jnp.float32).at[0, :d_out].set(b2.astype(jnp.float32))
    pt_p = jnp.zeros((d_out_p, k_p), jnp.float32).at[:d_out, :num_classes].set(
        prototypes.astype(jnp.float32).T)
    psq_p = jnp.zeros((1, k_p), jnp.float32).at[0, :num_classes].set(
        jnp.sum(prototypes.astype(jnp.float32) ** 2, axis=-1))

    return {
        "w1": w1_p, "b1": b1_p, "w2": w2_p, "b2": b2_p, "pt": pt_p, "psq": psq_p,
        "d_in": d_in, "num_classes": num_classes,
    }


# --------------------------------------------------------------------------- #
# Tiling / VMEM heuristics
# --------------------------------------------------------------------------- #
def _choose_tile_b(batch: int, d_in: int) -> int:
    """Batch tile: multiple of 16 (bf16 sublane packing), large (target 512) to
    amortize ~0.35us per-grid-step overhead, >=2 grid steps so v7x's two
    TensorCores both get work, capped so double-buffered f32 x tiles fit VMEM."""
    if batch <= 16:
        return batch                                   # single full-array tile
    tile = min(512, _round_up(_cdiv(batch, 2), 16))
    vmem_cap = max(16, ((24 << 20) // (2 * 4 * max(d_in, 1))) // 16 * 16)
    return max(16, min(tile, vmem_cap))


def _vmem_limit_bytes(tile_b, d_in, hid_p, d_out_p, k_p, weight_bufs):
    x_bytes = 2 * tile_b * d_in * 4                     # double-buffered x tiles (f32)
    out_bytes = 2 * tile_b * k_p * 4                    # double-buffered out tiles
    w_bytes = weight_bufs * (d_in * hid_p * 2 + hid_p * d_out_p * 2
                             + d_out_p * k_p * 4 + (hid_p + d_out_p + k_p) * 4)
    live = tile_b * (hid_p + d_out_p + 2 * k_p) * 4     # h, e, cross, d2 intermediates
    needed = x_bytes + out_bytes + w_bytes + live
    # floor raises v5e's 16 MiB scoped default; ceiling stays under v7x's 64 MiB
    return int(min(max(needed * 3 // 2, 32 << 20), 56 << 20))


# --------------------------------------------------------------------------- #
# Forward wrapper
# --------------------------------------------------------------------------- #
def ecl_forward(images, params, temperature=TEMPERATURE):
    """images: (B, C, H, W) f32 -> (B, num_classes) f32 of -dist/temperature."""
    batch = images.shape[0]
    d_in = params["d_in"]
    num_classes = params["num_classes"]
    hid_p = params["w1"].shape[1]
    d_out_p = params["w2"].shape[1]
    k_p = params["pt"].shape[1]

    # Free reshape/view; x is streamed as f32 straight from HBM (no padded copy,
    # no wrapper-side bf16 round-trip -- the cast happens in-kernel).
    x = images.reshape(batch, -1).astype(jnp.float32)
    assert x.shape[1] == d_in, f"backbone expects d_in={d_in}, got {x.shape[1]}"

    tile_b = _choose_tile_b(batch, d_in)
    b_pad = _round_up(batch, tile_b)
    if b_pad != batch:                 # only copy x when the batch tile is uneven
        x = jnp.zeros((b_pad, d_in), x.dtype).at[:batch].set(x)

    grid = (b_pad // tile_b,)
    flops = 2 * b_pad * (d_in * hid_p + hid_p * d_out_p + d_out_p * k_p)
    bytes_accessed = (b_pad * d_in * 4
                      + d_in * hid_p * 2 + hid_p * d_out_p * 2 + d_out_p * k_p * 4
                      + (hid_p + d_out_p + 2 * k_p) * 4
                      + b_pad * k_p * 4)

    def build_in_specs(single_buffer_weights):
        resident = {}
        if single_buffer_weights and hasattr(pl, "Buffered"):
            # constant-index operands stay VMEM-resident; no double buffer needed
            resident = {"pipeline_mode": pl.Buffered(1)}
        return [
            pl.BlockSpec((tile_b, d_in), lambda i: (i, 0)),          # x: streamed per tile
            pl.BlockSpec((d_in, hid_p), lambda i: (0, 0), **resident),
            pl.BlockSpec((1, hid_p), lambda i: (0, 0), **resident),
            pl.BlockSpec((hid_p, d_out_p), lambda i: (0, 0), **resident),
            pl.BlockSpec((1, d_out_p), lambda i: (0, 0), **resident),
            pl.BlockSpec((d_out_p, k_p), lambda i: (0, 0), **resident),
            pl.BlockSpec((1, k_p), lambda i: (0, 0), **resident),
        ]

    def run(single_buffer_weights):
        weight_bufs = 1 if single_buffer_weights else 2
        return pl.pallas_call(
            partial(ecl_kernel, neg_inv_temp=float(-1.0 / temperature)),
            out_shape=jax.ShapeDtypeStruct((b_pad, k_p), jnp.float32),
            grid=grid,
            in_specs=build_in_specs(single_buffer_weights),
            out_specs=pl.BlockSpec((tile_b, k_p), lambda i: (i, 0)),
            compiler_params=pltpu.CompilerParams(
                dimension_semantics=("parallel",),
                vmem_limit_bytes=_vmem_limit_bytes(
                    tile_b, d_in, hid_p, d_out_p, k_p, weight_bufs),
            ),
            cost_estimate=pl.CostEstimate(
                flops=int(flops),
                transcendentals=int(b_pad * k_p),
                bytes_accessed=int(bytes_accessed),
            ),
        )(x, params["w1"], params["b1"], params["w2"], params["b2"],
          params["pt"], params["psq"])

    # TODO(synk): for very large backbone inputs (d_in >~ 100k, e.g. raw ImageNet
    # pixels) add a second "arbitrary" grid axis over d_in chunks with a f32 VMEM
    # accumulator so the x/w1 tiles fit v7x's 64 MiB VMEM; not needed at these shapes.
    try:
        out_p = run(single_buffer_weights=True)
    except Exception:   # pragma: no cover - fallback if pipeline_mode unsupported
        out_p = run(single_buffer_weights=False)

    # slice away batch / class padding (padded rows/cols hold finite garbage;
    # never let the padded buffer escape via aliasing/donation)
    return out_p[:batch, :num_classes]


# --------------------------------------------------------------------------- #
# Synthetic backbone params + pure-JAX reference
# --------------------------------------------------------------------------- #
def init_params(key, d_in, hidden, d_out):
    """Synthetic backbone parameters.
    # TODO(synk): the spec's `self.model` backbone is an arbitrary nn.Module
    # passed at construction; stood in here with Linear -> ReLU -> Linear."""
    k1, k2, k3, k4 = jax.random.split(key, 4)
    w1 = jax.random.normal(k1, (d_in, hidden), jnp.float32) * (1.0 / jnp.sqrt(d_in))
    b1 = jax.random.normal(k2, (hidden,), jnp.float32) * 0.01
    w2 = jax.random.normal(k3, (hidden, d_out), jnp.float32) * (1.0 / jnp.sqrt(hidden))
    b2 = jax.random.normal(k4, (d_out,), jnp.float32) * 0.01
    return w1, b1, w2, b2


def reference_forward(images, w1, b1, w2, b2, prototypes, temperature):
    """Pure-JAX f32 reference mirroring ECL_model.forward."""
    x = images.reshape(images.shape[0], -1)
    h = jnp.maximum(x @ w1 + b1, 0.0)
    e = h @ w2 + b2
    d = jnp.linalg.norm(e[:, None, :] - prototypes[None, :, :], axis=-1)
    return -d / temperature


if __name__ == "__main__":
    key = jax.random.PRNGKey(0)
    k_img, k_par, k_proto = jax.random.split(key, 3)

    # MNIST-like toy input: batch=2, channels=1, spatial 16x16
    B, C, H, W = 2, 1, 16, 16
    images = jax.random.normal(k_img, (B, C, H, W), jnp.float32)

    w1, b1, w2, b2 = init_params(k_par, C * H * W, HIDDEN, OUTPUT_DIM)
    # prototypes ~ torch.rand((num_classes, output_dim))  (uniform [0, 1))
    prototypes = jax.random.uniform(k_proto, (NUM_CLASSES, OUTPUT_DIM), jnp.float32)

    # pad/cast static params once (hoisted out of the per-call path)
    params = prepare_params(w1, b1, w2, b2, prototypes)

    out = ecl_forward(images, params)
    out = jax.block_until_ready(out)

    ref = reference_forward(images, w1, b1, w2, b2, prototypes, TEMPERATURE)

    assert out.shape == (B, NUM_CLASSES)
    assert bool(jnp.all(jnp.isfinite(out)))
    assert bool(jnp.all(out <= 0.0))  # negated distances / temperature
    # loose tolerance: backbone matmuls run in bf16 on the MXU
    assert bool(jnp.allclose(out, ref, rtol=0.08, atol=5.0))
    print("KERNEL_OK")
</pallas_src>

<mosaic_0001>
module attributes {stable_mosaic.version = 11 : i64} {
  func.func @ecl_kernel(%arg0: i32, %arg1: memref<2x256xf32, #tpu.memory_space<vmem>>, %arg2: memref<256x128xbf16, #tpu.memory_space<vmem>>, %arg3: memref<1x128xf32, #tpu.memory_space<vmem>>, %arg4: memref<128x128xbf16, #tpu.memory_space<vmem>>, %arg5: memref<1x128xf32, #tpu.memory_space<vmem>>, %arg6: memref<128x128xf32, #tpu.memory_space<vmem>>, %arg7: memref<1x128xf32, #tpu.memory_space<vmem>>, %arg8: memref<2x128xf32, #tpu.memory_space<vmem>>) attributes {dimension_semantics = [#tpu.dimension_semantics<parallel>], iteration_bounds = array<i64: 1>, scalar_prefetch = 0 : i64, scratch_operands = 0 : i64, tpu.core_type = #tpu.core_type<tc>, window_params = [{transform_indices = @transform_0, window_bounds = array<i64: 2, 256>}, {pipeline_mode = #tpu.pipeline_mode<synchronous>, transform_indices = @transform_1, window_bounds = array<i64: 256, 128>}, {pipeline_mode = #tpu.pipeline_mode<synchronous>, transform_indices = @transform_2, window_bounds = array<i64: 1, 128>}, {pipeline_mode = #tpu.pipeline_mode<synchronous>, transform_indices = @transform_3, window_bounds = array<i64: 128, 128>}, {pipeline_mode = #tpu.pipeline_mode<synchronous>, transform_indices = @transform_4, window_bounds = array<i64: 1, 128>}, {pipeline_mode = #tpu.pipeline_mode<synchronous>, transform_indices = @transform_5, window_bounds = array<i64: 128, 128>}, {pipeline_mode = #tpu.pipeline_mode<synchronous>, transform_indices = @transform_6, window_bounds = array<i64: 1, 128>}, {transform_indices = @transform_7, window_bounds = array<i64: 2, 128>}]} {
    %c0 = arith.constant 0 : index
    %c0_0 = arith.constant 0 : index
    %0 = vector.load %arg1[%c0, %c0_0] : memref<2x256xf32, #tpu.memory_space<vmem>>, vector<2x256xf32>
    %1 = arith.truncf %0 : vector<2x256xf32> to vector<2x256xbf16>
    %c0_1 = arith.constant 0 : index
    %c0_2 = arith.constant 0 : index
    %2 = vector.load %arg2[%c0_1, %c0_2] : memref<256x128xbf16, #tpu.memory_space<vmem>>, vector<256x128xbf16>
    %cst = arith.constant dense<0.000000e+00> : vector<2x128xf32>
    %3 = tpu.matmul %1, %2, %cst {dimension_numbers = #tpu.dot_dimension_numbers<[1], [0], [0], [1], [0, 0, 1, 1], [], []>} : vector<2x256xbf16>, vector<256x128xbf16>, vector<2x128xf32> -> vector<2x128xf32>
    %c0_3 = arith.constant 0 : index
    %c0_4 = arith.constant 0 : index
    %4 = vector.load %arg3[%c0_3, %c0_4] : memref<1x128xf32, #tpu.memory_space<vmem>>, vector<1x128xf32>
    %5 = vector.broadcast %4 : vector<1x128xf32> to vector<2x128xf32>
    %6 = arith.addf %3, %5 : vector<2x128xf32>
    %cst_5 = arith.constant 0.000000e+00 : f32
    %7 = vector.broadcast %cst_5 : f32 to vector<2x128xf32>
    %8 = arith.maximumf %6, %7 : vector<2x128xf32>
    %9 = arith.truncf %8 : vector<2x128xf32> to vector<2x128xbf16>
    %c0_6 = arith.constant 0 : index
    %c0_7 = arith.constant 0 : index
    %10 = vector.load %arg4[%c0_6, %c0_7] : memref<128x128xbf16, #tpu.memory_space<vmem>>, vector<128x128xbf16>
    %cst_8 = arith.constant dense<0.000000e+00> : vector<2x128xf32>
    %11 = tpu.matmul %9, %10, %cst_8 {dimension_numbers = #tpu.dot_dimension_numbers<[1], [0], [0], [1], [0, 0, 1, 1], [], []>} : vector<2x128xbf16>, vector<128x128xbf16>, vector<2x128xf32> -> vector<2x128xf32>
    %c0_9 = arith.constant 0 : index
    %c0_10 = arith.constant 0 : index
    %12 = vector.load %arg5[%c0_9, %c0_10] : memref<1x128xf32, #tpu.memory_space<vmem>>, vector<1x128xf32>
    %13 = vector.broadcast %12 : vector<1x128xf32> to vector<2x128xf32>
    %14 = arith.addf %11, %13 : vector<2x128xf32>
    %15 = arith.mulf %14, %14 : vector<2x128xf32>
    %cst_11 = arith.constant dense<0.000000e+00> : vector<2xf32>
    %16 = vector.multi_reduction <add>, %15, %cst_11 [1] : vector<2x128xf32> to vector<2xf32>
    %17 = vector.shape_cast %16 : vector<2xf32> to vector<2x1xf32>
    %c0_12 = arith.constant 0 : index
    %c0_13 = arith.constant 0 : index
    %18 = vector.load %arg6[%c0_12, %c0_13] : memref<128x128xf32, #tpu.memory_space<vmem>>, vector<128x128xf32>
    %cst_14 = arith.constant dense<0.000000e+00> : vector<2x128xf32>
    %19 = tpu.matmul %14, %18, %cst_14 {dimension_numbers = #tpu.dot_dimension_numbers<[1], [0], [0], [1], [0, 0, 1, 1], [], []>} : vector<2x128xf32>, vector<128x128xf32>, vector<2x128xf32> -> vector<2x128xf32>
    %c0_15 = arith.constant 0 : index
    %c0_16 = arith.constant 0 : index
    %20 = vector.load %arg7[%c0_15, %c0_16] : memref<1x128xf32, #tpu.memory_space<vmem>>, vector<1x128xf32>
    %21 = vector.broadcast %17 : vector<2x1xf32> to vector<2x128xf32>
    %22 = vector.broadcast %20 : vector<1x128xf32> to vector<2x128xf32>
    %23 = arith.addf %21, %22 : vector<2x128xf32>
    %cst_17 = arith.constant 2.000000e+00 : f32
    %24 = vector.broadcast %cst_17 : f32 to vector<2x128xf32>
    %25 = arith.mulf %24, %19 : vector<2x128xf32>
    %26 = arith.subf %23, %25 : vector<2x128xf32>
    %cst_18 = arith.constant 0.000000e+00 : f32
    %27 = vector.broadcast %cst_18 : f32 to vector<2x128xf32>
    %28 = arith.maximumf %26, %27 : vector<2x128xf32>
    %29 = math.sqrt %28 : vector<2x128xf32>
    %cst_19 = arith.constant -1.000000e+02 : f32
    %30 = vector.broadcast %cst_19 : f32 to vector<2x128xf32>
    %31 = arith.mulf %29, %30 : vector<2x128xf32>
    %c0_20 = arith.constant 0 : index
    %c0_21 = arith.constant 0 : index
    %32 = vector.load %arg8[%c0_20, %c0_21] : memref<2x128xf32, #tpu.memory_space<vmem>>, vector<2x128xf32>
    tpu.vector_store %arg8[%c0_20, %c0_21], %31 {strides = array<i32>} : memref<2x128xf32, #tpu.memory_space<vmem>>, vector<2x128xf32>,
    return
  }
  func.func @transform_0(%arg0: i32) -> (i32, i32) {
    %c0_i32 = arith.constant 0 : i32
    %c0_i32_0 = arith.constant 0 : i32
    return %arg0, %c0_i32 : i32, i32
  }
  func.func @transform_1(%arg0: i32) -> (i32, i32) {
    %c0_i32 = arith.constant 0 : i32
    %c0_i32_0 = arith.constant 0 : i32
    %c0_i32_1 = arith.constant 0 : i32
    return %c0_i32, %c0_i32_0 : i32, i32
  }
  func.func @transform_2(%arg0: i32) -> (i32, i32) {
    %c0_i32 = arith.constant 0 : i32
    %c0_i32_0 = arith.constant 0 : i32
    %c0_i32_1 = arith.constant 0 : i32
    return %c0_i32, %c0_i32_0 : i32, i32
  }
  func.func @transform_3(%arg0: i32) -> (i32, i32) {
    %c0_i32 = arith.constant 0 : i32
    %c0_i32_0 = arith.constant 0 : i32
    %c0_i32_1 = arith.constant 0 : i32
    return %c0_i32, %c0_i32_0 : i32, i32
  }
  func.func @transform_4(%arg0: i32) -> (i32, i32) {
    %c0_i32 = arith.constant 0 : i32
    %c0_i32_0 = arith.constant 0 : i32
    %c0_i32_1 = arith.constant 0 : i32
    return %c0_i32, %c0_i32_0 : i32, i32
  }
  func.func @transform_5(%arg0: i32) -> (i32, i32) {
    %c0_i32 = arith.constant 0 : i32
    %c0_i32_0 = arith.constant 0 : i32
    %c0_i32_1 = arith.constant 0 : i32
    return %c0_i32, %c0_i32_0 : i32, i32
  }
  func.func @transform_6(%arg0: i32) -> (i32, i32) {
    %c0_i32 = arith.constant 0 : i32
    %c0_i32_0 = arith.constant 0 : i32
    %c0_i32_1 = arith.constant 0 : i32
    return %c0_i32, %c0_i32_0 : i32, i32
  }
  func.func @transform_7(%arg0: i32) -> (i32, i32) {
    %c0_i32 = arith.constant 0 : i32
    %c0_i32_0 = arith.constant 0 : i32
    return %arg0, %c0_i32 : i32, i32
  }
}

module attributes {stable_mosaic.version = 11 : i64} {
  func.func @ecl_kernel(%arg0: i32, %arg1: memref<2x256xf32, #tpu.memory_space<vmem>>, %arg2: memref<256x128xbf16, #tpu.memory_space<vmem>>, %arg3: memref<1x128xf32, #tpu.memory_space<vmem>>, %arg4: memref<128x128xbf16, #tpu.memory_space<vmem>>, %arg5: memref<1x128xf32, #tpu.memory_space<vmem>>, %arg6: memref<128x128xf32, #tpu.memory_space<vmem>>, %arg7: memref<1x128xf32, #tpu.memory_space<vmem>>, %arg8: memref<2x128xf32, #tpu.memory_space<vmem>>) attributes {dimension_semantics = [#tpu.dimension_semantics<parallel>], iteration_bounds = array<i64: 1>, scalar_prefetch = 0 : i64, scratch_operands = 0 : i64, tpu.core_type = #tpu.core_type<tc>, window_params = [{transform_indices = @transform_0, window_bounds = array<i64: 2, 256>}, {pipeline_mode = #tpu.pipeline_mode<synchronous>, transform_indices = @transform_1, window_bounds = array<i64: 256, 128>}, {pipeline_mode = #tpu.pipeline_mode<synchronous>, transform_indices = @transform_2, window_bounds = array<i64: 1, 128>}, {pipeline_mode = #tpu.pipeline_mode<synchronous>, transform_indices = @transform_3, window_bounds = array<i64: 128, 128>}, {pipeline_mode = #tpu.pipeline_mode<synchronous>, transform_indices = @transform_4, window_bounds = array<i64: 1, 128>}, {pipeline_mode = #tpu.pipeline_mode<synchronous>, transform_indices = @transform_5, window_bounds = array<i64: 128, 128>}, {pipeline_mode = #tpu.pipeline_mode<synchronous>, transform_indices = @transform_6, window_bounds = array<i64: 1, 128>}, {transform_indices = @transform_7, window_bounds = array<i64: 2, 128>}]} {
    %c0 = arith.constant 0 : index
    %c0_0 = arith.constant 0 : index
    %0 = vector.load %arg1[%c0, %c0_0] : memref<2x256xf32, #tpu.memory_space<vmem>>, vector<2x256xf32>
    %1 = arith.truncf %0 : vector<2x256xf32> to vector<2x256xbf16>
    %c0_1 = arith.constant 0 : index
    %c0_2 = arith.constant 0 : index
    %2 = vector.load %arg2[%c0_1, %c0_2] : memref<256x128xbf16, #tpu.memory_space<vmem>>, vector<256x128xbf16>
    %cst = arith.constant dense<0.000000e+00> : vector<2x128xf32>
    %3 = tpu.matmul %1, %2, %cst {dimension_numbers = #tpu.dot_dimension_numbers<[1], [0], [0], [1], [0, 0, 1, 1], [], []>} : vector<2x256xbf16>, vector<256x128xbf16>, vector<2x128xf32> -> vector<2x128xf32>
    %c0_3 = arith.constant 0 : index
    %c0_4 = arith.constant 0 : index
    %4 = vector.load %arg3[%c0_3, %c0_4] : memref<1x128xf32, #tpu.memory_space<vmem>>, vector<1x128xf32>
    %5 = vector.broadcast %4 : vector<1x128xf32> to vector<2x128xf32>
    %6 = arith.addf %3, %5 : vector<2x128xf32>
    %cst_5 = arith.constant 0.000000e+00 : f32
    %7 = vector.broadcast %cst_5 : f32 to vector<2x128xf32>
    %8 = arith.maximumf %6, %7 : vector<2x128xf32>
    %9 = arith.truncf %8 : vector<2x128xf32> to vector<2x128xbf16>
    %c0_6 = arith.constant 0 : index
    %c0_7 = arith.constant 0 : index
    %10 = vector.load %arg4[%c0_6, %c0_7] : memref<128x128xbf16, #tpu.memory_space<vmem>>, vector<128x128xbf16>
    %cst_8 = arith.constant dense<0.000000e+00> : vector<2x128xf32>
    %11 = tpu.matmul %9, %10, %cst_8 {dimension_numbers = #tpu.dot_dimension_numbers<[1], [0], [0], [1], [0, 0, 1, 1], [], []>} : vector<2x128xbf16>, vector<128x128xbf16>, vector<2x128xf32> -> vector<2x128xf32>
    %c0_9 = arith.constant 0 : index
    %c0_10 = arith.constant 0 : index
    %12 = vector.load %arg5[%c0_9, %c0_10] : memref<1x128xf32, #tpu.memory_space<vmem>>, vector<1x128xf32>
    %13 = vector.broadcast %12 : vector<1x128xf32> to vector<2x128xf32>
    %14 = arith.addf %11, %13 : vector<2x128xf32>
    %15 = arith.mulf %14, %14 : vector<2x128xf32>
    %cst_11 = arith.constant dense<0.000000e+00> : vector<2xf32>
    %16 = vector.multi_reduction <add>, %15, %cst_11 [1] : vector<2x128xf32> to vector<2xf32>
    %17 = vector.shape_cast %16 : vector<2xf32> to vector<2x1xf32>
    %c0_12 = arith.constant 0 : index
    %c0_13 = arith.constant 0 : index
    %18 = vector.load %arg6[%c0_12, %c0_13] : memref<128x128xf32, #tpu.memory_space<vmem>>, vector<128x128xf32>
    %cst_14 = arith.constant dense<0.000000e+00> : vector<2x128xf32>
    %19 = tpu.matmul %14, %18, %cst_14 {dimension_numbers = #tpu.dot_dimension_numbers<[1], [0], [0], [1], [0, 0, 1, 1], [], []>} : vector<2x128xf32>, vector<128x128xf32>, vector<2x128xf32> -> vector<2x128xf32>
    %c0_15 = arith.constant 0 : index
    %c0_16 = arith.constant 0 : index
    %20 = vector.load %arg7[%c0_15, %c0_16] : memref<1x128xf32, #tpu.memory_space<vmem>>, vector<1x128xf32>
    %21 = vector.broadcast %17 : vector<2x1xf32> to vector<2x128xf32>
    %22 = vector.broadcast %20 : vector<1x128xf32> to vector<2x128xf32>
    %23 = arith.addf %21, %22 : vector<2x128xf32>
    %cst_17 = arith.constant 2.000000e+00 : f32
    %24 = vector.broadcast %cst_17 : f32 to vector<2x128xf32>
    %25 = arith.mulf %24, %19 : vector<2x128xf32>
    %26 = arith.subf %23, %25 : vector<2x128xf32>
    %cst_18 = arith.constant 0.000000e+00 : f32
    %27 = vector.broadcast %cst_18 : f32 to vector<2x128xf32>
    %28 = arith.maximumf %26, %27 : vector<2x128xf32>
    %29 = math.sqrt %28 : vector<2x128xf32>
    %cst_19 = arith.constant -1.000000e+02 : f32
    %30 = vector.broadcast %cst_19 : f32 to vector<2x128xf32>
    %31 = arith.mulf %29, %30 : vector<2x128xf32>
    %c0_20 = arith.constant 0 : index
    %c0_21 = arith.constant 0 : index
    %32 = vector.load %arg8[%c0_20, %c0_21] : memref<2x128xf32, #tpu.memory_space<vmem>>, vector<2x128xf32>
    tpu.vector_store %arg8[%c0_20, %c0_21], %31 {strides = array<i32>} : memref<2x128xf32, #tpu.memory_space<vmem>>, vector<2x128xf32>,
    return
  }
  func.func @transform_0(%arg0: i32) -> (i32, i32) {
    %c0_i32 = arith.constant 0 : i32
    %c0_i32_0 = arith.constant 0 : i32
    return %arg0, %c0_i32 : i32, i32
  }
  func.func @transform_1(%arg0: i32) -> (i32, i32) {
    %c0_i32 = arith.constant 0 : i32
    %c0_i32_0 = arith.constant 0 : i32
    %c0_i32_1 = arith.constant 0 : i32
    return %c0_i32, %c0_i32_0 : i32, i32
  }
  func.func @transform_2(%arg0: i32) -> (i32, i32) {
    %c0_i32 = arith.constant 0 : i32
    %c0_i32_0 = arith.constant 0 : i32
    %c0_i32_1 = arith.constant 0 : i32
    return %c0_i32, %c0_i32_0 : i32, i32
  }
  func.func @transform_3(%arg0: i32) -> (i32, i32) {
    %c0_i32 = arith.constant 0 : i32
    %c0_i32_0 = arith.constant 0 : i32
    %c0_i32_1 = arith.constant 0 : i32
    return %c0_i32, %c0_i32_0 : i32, i32
  }
  func.func @transform_4(%arg0: i32) -> (i32, i32) {
    %c0_i32 = arith.constant 0 : i32
    %c0_i32_0 = arith.constant 0 : i32
    %c0_i32_1 = arith.constant 0 : i32
    return %c0_i32, %c0_i32_0 : i32, i32
  }
  func.func @transform_5(%arg0: i32) -> (i32, i32) {
    %c0_i32 = arith.constant 0 : i32
    %c0_i32_0 = arith.constant 0 : i32
    %c0_i32_1 = arith.constant 0 : i32
    return %c0_i32, %c0_i32_0 : i32, i32
  }
  func.func @transform_6(%arg0: i32) -> (i32, i32) {
    %c0_i32 = arith.constant 0 : i32
    %c0_i32_0 = arith.constant 0 : i32
    %c0_i32_1 = arith.constant 0 : i32
    return %c0_i32, %c0_i32_0 : i32, i32
  }
  func.func @transform_7(%arg0: i32) -> (i32, i32) {
    %c0_i32 = arith.constant 0 : i32
    %c0_i32_0 = arith.constant 0 : i32
    return %arg0, %c0_i32 : i32, i32
  }
}

</mosaic_0001>

<bundles_post_ra>
// kernel: tpu_custom_call.1
= control target key start
LH: loop header
LB: loop body
LE: loop exit
PB: predicated region body
PF: predicated region fallthrough
CT: control target
= control target key end

     0   :  { %12 = vsyncpa [#allocation3], 0  ;;  %s959_s0 = inlined_call_operand.hbm [shape: f32[2,256], index: 0, kind: input, shape index: {}]   ;;  %s960_s1 = inlined_call_operand.hbm [shape: bf16[256,128], index: 1, kind: input, shape index: {}]   ;;  %s961_s2 = inlined_call_operand.vmem [shape: f32[1,128], index: 2, kind: input, shape index: {}]   ;;  %s962_s3 = inlined_call_operand.hbm [shape: bf16[128,128], index: 3, kind: input, shape index: {}]   ;;  %s963_s4 = inlined_call_operand.vmem [shape: f32[1,128], index: 4, kind: input, shape index: {}]   ;;  %s964_s5 = inlined_call_operand.hbm [shape: f32[128,128], index: 5, kind: input, shape index: {}]   ;;  %s965_s6 = inlined_call_operand.vmem [shape: f32[1,128], index: 6, kind: input, shape index: {}]   ;;  %s966_s7 = inlined_call_operand.hbm [shape: f32[2,128], index: 7, kind: output, shape index: {}]  }
   0x1   :  { %13 = vsyncpa [#allocation6], 0 }
   0x2   :  { %14 = vsyncpa [#allocation9], 0 }
   0x3   :  { %15 = vsyncpa [#allocation4], 0  ;;  %s822_s24 = smov [#allocation5]   ;;  %s704_s28 = scalar_lea.hbm %s960_s1, 2048 }
   0x4   :  { %s31_s25 = sshll.u32 %s822_s24, 4  ;;  %p705_p0 = scmp.ne.s32.totalorder %s960_s1, %s704_s28  ;;  %s32_s25 = int_to_ptr.vmem [resolvable:$true] %s31_s25 }
   0x5   :  { %p708_p1 = scmp.lt.u32.totalorder %s704_s28, %s960_s1 }
   0x7   :  { %p710_p2 = pnand %p708_p1, %p705_p0 }
   0x9   :  { %713 = shalt.err (!%p710_p2)
}
   0xa   :  { %s714_s10 = scalar_lea.vmem %s32_s25, 2048  ;;  %p719_p4 = scmp.lt.s32.totalorder %s32_s25, %s32_s25 }
   0xb   :  { %p715_p3 = scmp.ne.s32.totalorder %s32_s25, %s714_s10  ;;  %p720_p5 = scmp.lt.s32.totalorder %s714_s10, %s714_s10 }
   0xd   :  { %p721_p6 = por %p720_p5, %p719_p4 }
   0xf   :  { %p722_p7 = pnand %p721_p6, %p715_p3 }
  0x11   :  { %725 = shalt.err (!%p722_p7)
}
  0x12   :  { %s823_s11 = smov 64   ;;  %s824_s12 = smov 4  }
  0x13   :  { %37 = dma.hbm_to_vmem [thread:$0]  %s960_s1, 2048, %s32_s25, [#allocation6], %s823_s11, %s823_s11, %s824_s12  }
  0x14   :  { %s825_s15 = smov [#allocation2]   ;;  %s826_s17 = smov [#allocation7]  }
  0x15   :  { %s22_s16 = sshll.u32 %s825_s15, 4  ;;  %s45_s18 = sshll.u32 %s826_s17, 4  ;;  %s23_s16 = int_to_ptr.vmem [resolvable:$true] %s22_s16  ;;  %s46_s18 = int_to_ptr.vmem [resolvable:$true] %s45_s18 }
  0x16   :  { %s726_s21 = scalar_lea.hbm %s959_s0, 64 }
  0x17   :  { %p727_p8 = scmp.ne.s32.totalorder %s959_s0, %s726_s21  ;;  %p730_p9 = scmp.lt.u32.totalorder %s726_s21, %s959_s0 }
  0x19   :  { %p732_p10 = pnand %p730_p9, %p727_p8 }
  0x1b   :  { %735 = shalt.err (!%p732_p10)
}
  0x1c   :  { %s736_s1 = scalar_lea.vmem %s23_s16, 64  ;;  %p741_p12 = scmp.lt.s32.totalorder %s23_s16, %s23_s16 }
  0x1d   :  { %p737_p11 = scmp.ne.s32.totalorder %s23_s16, %s736_s1  ;;  %p742_p13 = scmp.lt.s32.totalorder %s736_s1, %s736_s1 }
  0x1f   :  { %p743_p0 = por %p742_p13, %p741_p12 }
  0x21   :  { %p744_p1 = pnand %p743_p0, %p737_p11 }
  0x23   :  { %747 = shalt.err (!%p744_p1)
}
  0x24   :  { %25 = dma.hbm_to_vmem [thread:$0]  %s959_s0, 64, %s23_s16, [#allocation3]  }
  0x25   :  { %s748_s30 = scalar_lea.hbm %s962_s3, 1024 }
  0x26   :  { %p749_p2 = scmp.ne.s32.totalorder %s962_s3, %s748_s30  ;;  %p752_p3 = scmp.lt.u32.totalorder %s748_s30, %s962_s3 }
  0x28   :  { %p754_p4 = pnand %p752_p3, %p749_p2 }
  0x2a   :  { %757 = shalt.err (!%p754_p4)
}
  0x2b   :  { %s758_s14 = scalar_lea.vmem %s46_s18, 1024  ;;  %p763_p6 = scmp.lt.s32.totalorder %s46_s18, %s46_s18 }
  0x2c   :  { %p759_p5 = scmp.ne.s32.totalorder %s46_s18, %s758_s14  ;;  %p764_p7 = scmp.lt.s32.totalorder %s758_s14, %s758_s14 }
  0x2e   :  { %p765_p8 = por %p764_p7, %p763_p6 }
  0x30   :  { %p766_p9 = pnand %p765_p8, %p759_p5 }
  0x32   :  { %769 = shalt.err (!%p766_p9)
}
  0x33   :  { %51 = dma.hbm_to_vmem [thread:$0]  %s962_s3, 1024, %s46_s18, [#allocation6], %s823_s11, %s823_s11, %s824_s12  }
  0x34   :  { %s827_s16 = smov [#allocation8]   ;;  %s770_s21 = scalar_lea.hbm %s964_s5, 2048 }
  0x35   :  { %s59_s17 = sshll.u32 %s827_s16, 4  ;;  %p771_p10 = scmp.ne.s32.totalorder %s964_s5, %s770_s21  ;;  %s60_s17 = int_to_ptr.vmem [resolvable:$true] %s59_s17 }
  0x36   :  { %p774_p11 = scmp.lt.u32.totalorder %s770_s21, %s964_s5 }
  0x38   :  { %p776_p12 = pnand %p774_p11, %p771_p10 }
  0x3a   :  { %779 = shalt.err (!%p776_p12)
}
  0x3b   :  { %s780_s1 = scalar_lea.vmem %s60_s17, 2048  ;;  %p785_p0 = scmp.lt.s32.totalorder %s60_s17, %s60_s17 }
  0x3c   :  { %p781_p13 = scmp.ne.s32.totalorder %s60_s17, %s780_s1  ;;  %p786_p1 = scmp.lt.s32.totalorder %s780_s1, %s780_s1 }
  0x3e   :  { %p787_p2 = por %p786_p1, %p785_p0 }
  0x40   :  { %p788_p3 = pnand %p787_p2, %p781_p13 }
  0x42   :  { %791 = shalt.err (!%p788_p3)
}
  0x43   :  { %s828_s3 = smov 128   ;;  %s829_s11 = smov 8  }
  0x44   :  { %65 = dma.hbm_to_vmem [thread:$0]  %s964_s5, 2048, %s60_s17, [#allocation9], %s828_s3, %s828_s3, %s829_s11  }
  0x45   :  { %814 = dma.done.wait [#allocation3], 64  }
  0x46   :  { %815 = vsyncadd [#allocation3], 4294967232 }
  0x47   :  { %816 = dma.done.wait [#allocation6], 3072  }
  0x48   :  { %817 = vsyncadd [#allocation6], 4294964224 }
  0x49   :  { %818 = dma.done.wait [#allocation9], 2048  }
  0x4a   :  { %819 = vsyncadd [#allocation9], 4294965248  ;;  %v830_v0 = vmov 0.0   ;;  %v678_v1 = vld [vmem:[#allocation5 + $0x40] sm:$0xff]   ;;  %v680_v3 = vld [vmem:[#allocation5 + $0x48] sm:$0xff]   ;;  %vm831_vm0 = vmmov 0  }
  0x4b   :  { %587 = vmatprep.subr.bf16.mxu1 %v830_v0  ;;  %v679_v2 = vld [vmem:[#allocation5] sm:$0xff]   ;;  %539 = vmatprep.subr.bf16.mxu0 %v678_v1  ;;  %v681_v4 = vld [vmem:[#allocation5 + $0x8] sm:$0xff]   ;;  %v682_v5 = vld [vmem:[#allocation5 + $0x50] sm:$0xff]   ;;  %v832_v32 = vmov 0.0|0.0   ;;  %vm384_vm1 = vcmask 1041408  }
  0x4c   :  { %540 = vmatpush3.bf16.msra.mxu0 %v679_v2  ;;  %v683_v6 = vld [vmem:[#allocation5 + $0x10] sm:$0xff]   ;;  %v684_v7 = vld [vmem:[#allocation5 + $0x58] sm:$0xff]   ;;  %v686_v9 = vld [vmem:[#allocation5 + $0x60] sm:$0xff]   ;;  %603 = vmatprep.mubr.msk.bf16.mxu1 %vm831_vm0, %v830_v0 }
  0x4d   :  { %541 = vmatprep.subr.bf16.mxu0 %v680_v3  ;;  %v685_v8 = vld [vmem:[#allocation5 + $0x18] sm:$0xff]   ;;  %v687_v10 = vld [vmem:[#allocation5 + $0x20] sm:$0xff]   ;;  %v688_v11 = vld [vmem:[#allocation5 + $0x68] sm:$0xff]  }
  0x4e   :  { %v511_v12 = vld.sshfl [vmem:[#allocation2] sm:$0x33 pattern:$0x76325410]  ;;  %v694_v14 = vld [vmem:[#allocation7] sm:$0xff]   ;;  %v689_v15 = vld [vmem:[#allocation5 + $0x28] sm:$0xff]  }
  0x4f   :  { %v90_v13 = vcombine.high %v511_v12, %v511_v12  ;;  %588 = vmatpush3.bf16.msra.mxu1 %v694_v14  ;;  %v695_v17 = vld [vmem:[#allocation7 + $0x8] sm:$0xff]   ;;  %v690_v18 = vld [vmem:[#allocation5 + $0x70] sm:$0xff]   ;;  %v692_v21 = vld [vmem:[#allocation5 + $0x78] sm:$0xff]   ;;  %v93_v24 = vpack.c.bf16 %v511_v12, %v511_v12 }
  0x50   :  { %542 = vmatpush3.bf16.msra.mxu0 %v681_v4  ;;  %589 = vmatprep.subr.bf16.mxu1 %v830_v0  ;;  %v691_v19 = vld [vmem:[#allocation5 + $0x30] sm:$0xff]   ;;  %v693_v22 = vld [vmem:[#allocation5 + $0x38] sm:$0xff]   ;;  %v698_v25 = vld [vmem:[#allocation7 + $0x20] sm:$0xff]  }
  0x51   :  { %543 = vmatprep.subr.bf16.mxu0 %v682_v5  ;;  %v94_v16 = vpack.c.bf16 %v90_v13, %v90_v13  ;;  %v696_v20 = vld [vmem:[#allocation7 + $0x10] sm:$0xff]   ;;  %v697_v23 = vld [vmem:[#allocation7 + $0x18] sm:$0xff]   ;;  %v699_v26 = vld [vmem:[#allocation7 + $0x28] sm:$0xff]  }
  0x52   :  { %v700_v27 = vld [vmem:[#allocation7 + $0x30] sm:$0xff]   ;;  %v701_v28 = vld [vmem:[#allocation7 + $0x38] sm:$0xff]   ;;  %v388_v29 = vld [vmem:[#allocation8] sm:$0xff] }
  0x53   :  { %262 = vmatprep.mubr.bf16.mxu0 %v94_v16  ;;  %590 = vmatpush3.bf16.msra.mxu1 %v695_v17  ;;  %v389_v30 = vld [vmem:[#allocation8 + $0x8] sm:$0xff]  ;;  %v390_v31 = vld [vmem:[#allocation8 + $0x10] sm:$0xff]  ;;  %v391_v34 = vld [vmem:[#allocation8 + $0x18] sm:$0xff] }
  0x54   :  { %544 = vmatpush3.bf16.msra.mxu0 %v683_v6  ;;  %591 = vmatprep.subr.bf16.mxu1 %v830_v0  ;;  %v643_v33 = vpack.c.bf16 %v389_v30, %v388_v29  ;;  %v646_v35 = vpack.c.bf16 %v391_v34, %v390_v31  ;;  %v392_v36 = vld [vmem:[#allocation8 + $0x20] sm:$0xff]  ;;  %v393_v37 = vld [vmem:[#allocation8 + $0x28] sm:$0xff]  ;;  %v394_v39 = vld [vmem:[#allocation8 + $0x30] sm:$0xff] }
  0x55   :  { %545 = vmatprep.subr.bf16.mxu0 %v684_v7  ;;  %v649_v38 = vpack.c.bf16 %v393_v37, %v392_v36  ;;  %v395_v40 = vld [vmem:[#allocation8 + $0x38] sm:$0xff]  ;;  %v396_v42 = vld [vmem:[#allocation8 + $0x40] sm:$0xff]  ;;  %v397_v43 = vld [vmem:[#allocation8 + $0x48] sm:$0xff] }
  0x56   :  { %v652_v41 = vpack.c.bf16 %v395_v40, %v394_v39  ;;  %v655_v44 = vpack.c.bf16 %v397_v43, %v396_v42  ;;  %v398_v45 = vld [vmem:[#allocation8 + $0x50] sm:$0xff]  ;;  %v399_v46 = vld [vmem:[#allocation8 + $0x58] sm:$0xff]  ;;  %v400_v48 = vld [vmem:[#allocation8 + $0x60] sm:$0xff] }
  0x57   :  { %592 = vmatpush3.bf16.msra.mxu1 %v696_v20  ;;  %v658_v47 = vpack.c.bf16 %v399_v46, %v398_v45  ;;  %v401_v49 = vld [vmem:[#allocation8 + $0x68] sm:$0xff]  ;;  %v512_v52 = vld [vmem:[%s961_s2] ss:$0 sm:$0xff]  ;;  %v402_v60 = vld [vmem:[#allocation8 + $0x70] sm:$0xff] }
  0x58   :  { %546 = vmatpush3.bf16.msra.mxu0 %v685_v8  ;;  %593 = vmatprep.subr.bf16.mxu1 %v830_v0  ;;  %v661_v50 = vpack.c.bf16 %v401_v49, %v400_v48  ;;  %v403_v61 = vld [vmem:[#allocation8 + $0x78] sm:$0xff] }
  0x59   :  { %547 = vmatprep.subr.bf16.mxu0 %v686_v9  ;;  %v664_v62 = vpack.c.bf16 %v403_v61, %v402_v60  ;;  %v529_v63 = vld [vmem:[%s963_s4] ss:$0 sm:$0xff]  ;;  %s833_s4 = smov [#allocation10]  }
  0x5a   :  { %v538_v8 = vld [vmem:[%s965_s6] ss:$0 sm:$0xff]  ;;  %s500_s30 = sshll.u32 %s833_s4, 4  ;;  %s501_s30 = int_to_ptr.vmem [resolvable:$true] %s500_s30 }
  0x5b   :  { %594 = vmatpush3.bf16.msra.mxu1 %v697_v23  ;;  %s792_s6 = scalar_lea.vmem %s501_s30, 32  ;;  %p797_p5 = scmp.lt.s32.totalorder %s501_s30, %s501_s30 }
  0x5c   :  { %548 = vmatpush3.bf16.msra.mxu0 %v687_v10  ;;  %595 = vmatprep.subr.bf16.mxu1 %v830_v0  ;;  %p793_p4 = scmp.ne.s32.totalorder %s501_s30, %s792_s6  ;;  %p798_p6 = scmp.lt.s32.totalorder %s792_s6, %s792_s6 }
  0x5d   :  { %549 = vmatprep.subr.bf16.mxu0 %v688_v11 }
  0x5e   :  { %p799_p7 = por %p798_p6, %p797_p5 }
  0x5f   :  { %596 = vmatpush3.bf16.msra.mxu1 %v698_v25 }
  0x60   :  { %550 = vmatpush3.bf16.msra.mxu0 %v689_v15  ;;  %597 = vmatprep.subr.bf16.mxu1 %v830_v0  ;;  %p800_p8 = pnand %p799_p7, %p793_p4 }
  0x61   :  { %551 = vmatprep.subr.bf16.mxu0 %v690_v18 }
  0x63   :  { %598 = vmatpush3.bf16.msra.mxu1 %v699_v26 }
  0x64   :  { %552 = vmatpush3.bf16.msra.mxu0 %v691_v19  ;;  %599 = vmatprep.subr.bf16.mxu1 %v830_v0 }
  0x65   :  { %553 = vmatprep.subr.bf16.mxu0 %v692_v21 }
  0x67   :  { %600 = vmatpush3.bf16.msra.mxu1 %v700_v27 }
  0x68   :  { %554 = vmatpush3.bf16.msra.mxu0 %v693_v22  ;;  %601 = vmatprep.subr.bf16.mxu1 %v830_v0 }
  0x69   :  { %642 = vmatprep.subr.bf16.mxu0 %v832_v32 }
  0x6b   :  { %263 = vmatmul.mubr.bf16.vlgmr.msra.gmra.mrb[0].mxu0 %v93_v24  ;;  %602 = vmatpush3.bf16.msra.mxu1 %v701_v28 }
  0x6c   :  { %639 = vmatprep.mubr.msk.f32.mxu0 %vm831_vm0, %v830_v0  ;;  %644 = vmatpush3.bf16.msra.mxu0 %v643_v33 }
  0x6d   :  { %645 = vmatprep.subr.bf16.mxu0 %v832_v32 }
  0x70   :  { %647 = vmatpush3.bf16.msra.mxu0 %v646_v35 }
  0x71   :  { %648 = vmatprep.subr.bf16.mxu0 %v832_v32 }
  0x74   :  { %650 = vmatpush3.bf16.msra.mxu0 %v649_v38 }
  0x75   :  { %651 = vmatprep.subr.bf16.mxu0 %v832_v32 }
  0x78   :  { %653 = vmatpush3.bf16.msra.mxu0 %v652_v41 }
  0x79   :  { %654 = vmatprep.subr.bf16.mxu0 %v832_v32 }
  0x7c   :  { %656 = vmatpush3.bf16.msra.mxu0 %v655_v44 }
  0x7d   :  { %657 = vmatprep.subr.bf16.mxu0 %v832_v32 }
  0x80   :  { %659 = vmatpush3.bf16.msra.mxu0 %v658_v47 }
  0x81   :  { %660 = vmatprep.subr.bf16.mxu0 %v832_v32 }
  0x84   :  { %662 = vmatpush3.bf16.msra.mxu0 %v661_v50 }
  0x85   :  { %663 = vmatprep.subr.bf16.mxu0 %v832_v32 }
  0x88   :  { %665 = vmatpush3.bf16.msra.mxu0 %v664_v62 }
 0x13e   :  { %v555_v51 = vpop.f32.mrb[0].mxu0 }
 0x13f   :  { %v556_v53 = vpop.f32.mrb[1].mxu0 }
 0x140   :  { %v557_v54 = vadd.f32 %v556_v53, %v555_v51  ;;  %v558_v55 = vpop.f32.mrb[2].mxu0 }
 0x141   :  { %v559_v56 = vpop.f32.mrb[3].mxu0 }
 0x142   :  { %v265_v57 = vadd.f32 %v557_v54, %v512_v52 }
 0x144   :  { %v270_v58 = vmax.f32 %v265_v57, 0.0 }
 0x146   :  { %v271_v59 = vpack.c.bf16 %v270_v58, %v270_v58 }
 0x148   :  { %604 = vmatmul.mubr.bf16.vlgmr.msra.gmra.mrb[0].mxu1 %v271_v59 }
 0x21b   :  { %v377_v0 = vpop.f32.mrb[0].mxu1 }
 0x21c   :  { %v378_v1 = vadd.f32 %v529_v63, %v377_v0  ;;  %v605_v2 = vpop.f32.mrb[1].mxu1 }
 0x21d   :  { %v380_v3 = vpop.f32.mrb[2].mxu1 }
 0x21e   :  { %v606_v4 = vpop.f32.mrb[3].mxu1  ;;  %640 = vmatmul.mubr.f32.vlgmr.msra.gmra.mrb[4].mxu0 %v378_v1  ;;  %v383_v5 = vmul.f32 %v378_v1, %v378_v1 }
 0x220   :  { %v385_v6 = vsel %vm384_vm1, %v383_v5, 0.0 }
 0x221   :  { %386 = vadd.xlane.f32.xlu0 %v385_v6 }
 0x2ae   :  { %v387_v7 = vpop.xlane.xlu0 %386 }
 0x2af   :  { %v481_v10 = vadd.f32 %v538_v8, %v387_v7 }
 0x2f1   :  { %v470_v9 = vpop.f32.mrb[4].mxu0 }
 0x2f2   :  { %v482_v11 = vmul.f32 2.0, %v470_v9  ;;  %v641_v12 = vpop.f32.mrb[5].mxu0 }
 0x2f4   :  { %v483_v13 = vsub.f32 %v481_v10, %v482_v11 }
 0x2f6   :  { %v484_v14 = vmax.f32 %v483_v13, 0.0 }
 0x2f8   :  { %702 = vrsqrt.f32 %v484_v14  ;;  %vm487_vm2 = vcmp.eq.f32.partialorder %v484_v14, inf  ;;  %v490_v17 = vand.u32 2147483648, %v484_v14  ;;  %vm489_vm3 = vcmp.eq.f32.partialorder %v484_v14, 0.0 }
 0x302   :  { %v703_v15 = vpop.eup %702 }
 0x303   :  { %v486_v16 = vmul.f32 %v703_v15, %v484_v14 }
 0x305   :  { %v488_v18 = vsel %vm487_vm2, %v484_v14, %v486_v16 }
 0x306   :  { %v491_v19 = vsel %vm489_vm3, %v490_v17, %v488_v18 }
 0x307   :  { %v492_v20 = vmul.f32 -100.0, %v491_v19 }
 0x309   :  { %493 = vst [vmem:[#allocation10] sm:$0x3] %v492_v20 }
 0x30a   :  { %803 = shalt.err (!%p800_p8)
}
 0x30b   :  { %s804_s10 = scalar_lea.hbm %s966_s7, 32 }
 0x30c   :  { %p805_p9 = scmp.ne.s32.totalorder %s966_s7, %s804_s10  ;;  %p808_p10 = scmp.lt.u32.totalorder %s804_s10, %s966_s7 }
 0x30e   :  { %p810_p11 = pnand %p808_p10, %p805_p9 }
 0x310   :  { %813 = shalt.err (!%p810_p11)
}
 0x311   :  { %503 = dma.vmem_to_hbm [thread:$0]  %s501_s30, 32, %s966_s7, [#allocation4]  }
 0x312   :  { %820 = dma.done.wait [#allocation4], 32  }
 0x313   :  { %821 = vsyncadd [#allocation4], 4294967264 }
 0x314   :  { %507 = vsyncpa [#allocation3], 1 }
 0x315   :  { %508 = vsyncpa [#allocation6], 1 }
 0x316   :  { %509 = vsyncpa [#allocation9], 1 }
 0x317   :  { %510 = vsyncpa [#allocation4], 1 }

// kernel: tpu_custom_call.1
= control target key start
LH: loop header
LB: loop body
LE: loop exit
PB: predicated region body
PF: predicated region fallthrough
CT: control target
= control target key end

     0   :  { %12 = vsyncpa [#allocation3], 0  ;;  %s959_s0 = inlined_call_operand.hbm [shape: f32[2,256], index: 0, kind: input, shape index: {}]   ;;  %s960_s1 = inlined_call_operand.hbm [shape: bf16[256,128], index: 1, kind: input, shape index: {}]   ;;  %s961_s2 = inlined_call_operand.vmem [shape: f32[1,128], index: 2, kind: input, shape index: {}]   ;;  %s962_s3 = inlined_call_operand.hbm [shape: bf16[128,128], index: 3, kind: input, shape index: {}]   ;;  %s963_s4 = inlined_call_operand.vmem [shape: f32[1,128], index: 4, kind: input, shape index: {}]   ;;  %s964_s5 = inlined_call_operand.hbm [shape: f32[128,128], index: 5, kind: input, shape index: {}]   ;;  %s965_s6 = inlined_call_operand.vmem [shape: f32[1,128], index: 6, kind: input, shape index: {}]   ;;  %s966_s7 = inlined_call_operand.hbm [shape: f32[2,128], index: 7, kind: output, shape index: {}]  }
   0x1   :  { %13 = vsyncpa [#allocation6], 0 }
   0x2   :  { %14 = vsyncpa [#allocation9], 0 }
   0x3   :  { %15 = vsyncpa [#allocation4], 0  ;;  %s822_s24 = smov [#allocation5]   ;;  %s704_s28 = scalar_lea.hbm %s960_s1, 2048 }
   0x4   :  { %s31_s25 = sshll.u32 %s822_s24, 4  ;;  %p705_p0 = scmp.ne.s32.totalorder %s960_s1, %s704_s28  ;;  %s32_s25 = int_to_ptr.vmem [resolvable:$true] %s31_s25 }
   0x5   :  { %p708_p1 = scmp.lt.u32.totalorder %s704_s28, %s960_s1 }
   0x7   :  { %p710_p2 = pnand %p708_p1, %p705_p0 }
   0x9   :  { %713 = shalt.err (!%p710_p2)
}
   0xa   :  { %s714_s10 = scalar_lea.vmem %s32_s25, 2048  ;;  %p719_p4 = scmp.lt.s32.totalorder %s32_s25, %s32_s25 }
   0xb   :  { %p715_p3 = scmp.ne.s32.totalorder %s32_s25, %s714_s10  ;;  %p720_p5 = scmp.lt.s32.totalorder %s714_s10, %s714_s10 }
   0xd   :  { %p721_p6 = por %p720_p5, %p719_p4 }
   0xf   :  { %p722_p7 = pnand %p721_p6, %p715_p3 }
  0x11   :  { %725 = shalt.err (!%p722_p7)
}
  0x12   :  { %s823_s11 = smov 64   ;;  %s824_s12 = smov 4  }
  0x13   :  { %37 = dma.hbm_to_vmem [thread:$0]  %s960_s1, 2048, %s32_s25, [#allocation6], %s823_s11, %s823_s11, %s824_s12  }
  0x14   :  { %s825_s15 = smov [#allocation2]   ;;  %s826_s17 = smov [#allocation7]  }
  0x15   :  { %s22_s16 = sshll.u32 %s825_s15, 4  ;;  %s45_s18 = sshll.u32 %s826_s17, 4  ;;  %s23_s16 = int_to_ptr.vmem [resolvable:$true] %s22_s16  ;;  %s46_s18 = int_to_ptr.vmem [resolvable:$true] %s45_s18 }
  0x16   :  { %s726_s21 = scalar_lea.hbm %s959_s0, 64 }
  0x17   :  { %p727_p8 = scmp.ne.s32.totalorder %s959_s0, %s726_s21  ;;  %p730_p9 = scmp.lt.u32.totalorder %s726_s21, %s959_s0 }
  0x19   :  { %p732_p10 = pnand %p730_p9, %p727_p8 }
  0x1b   :  { %735 = shalt.err (!%p732_p10)
}
  0x1c   :  { %s736_s1 = scalar_lea.vmem %s23_s16, 64  ;;  %p741_p12 = scmp.lt.s32.totalorder %s23_s16, %s23_s16 }
  0x1d   :  { %p737_p11 = scmp.ne.s32.totalorder %s23_s16, %s736_s1  ;;  %p742_p13 = scmp.lt.s32.totalorder %s736_s1, %s736_s1 }
  0x1f   :  { %p743_p0 = por %p742_p13, %p741_p12 }
  0x21   :  { %p744_p1 = pnand %p743_p0, %p737_p11 }
  0x23   :  { %747 = shalt.err (!%p744_p1)
}
  0x24   :  { %25 = dma.hbm_to_vmem [thread:$0]  %s959_s0, 64, %s23_s16, [#allocation3]  }
  0x25   :  { %s748_s30 = scalar_lea.hbm %s962_s3, 1024 }
  0x26   :  { %p749_p2 = scmp.ne.s32.totalorder %s962_s3, %s748_s30  ;;  %p752_p3 = scmp.lt.u32.totalorder %s748_s30, %s962_s3 }
  0x28   :  { %p754_p4 = pnand %p752_p3, %p749_p2 }
  0x2a   :  { %757 = shalt.err (!%p754_p4)
}
  0x2b   :  { %s758_s14 = scalar_lea.vmem %s46_s18, 1024  ;;  %p763_p6 = scmp.lt.s32.totalorder %s46_s18, %s46_s18 }
  0x2c   :  { %p759_p5 = scmp.ne.s32.totalorder %s46_s18, %s758_s14  ;;  %p764_p7 = scmp.lt.s32.totalorder %s758_s14, %s758_s14 }
  0x2e   :  { %p765_p8 = por %p764_p7, %p763_p6 }
  0x30   :  { %p766_p9 = pnand %p765_p8, %p759_p5 }
  0x32   :  { %769 = shalt.err (!%p766_p9)
}
  0x33   :  { %51 = dma.hbm_to_vmem [thread:$0]  %s962_s3, 1024, %s46_s18, [#allocation6], %s823_s11, %s823_s11, %s824_s12  }
  0x34   :  { %s827_s16 = smov [#allocation8]   ;;  %s770_s21 = scalar_lea.hbm %s964_s5, 2048 }
  0x35   :  { %s59_s17 = sshll.u32 %s827_s16, 4  ;;  %p771_p10 = scmp.ne.s32.totalorder %s964_s5, %s770_s21  ;;  %s60_s17 = int_to_ptr.vmem [resolvable:$true] %s59_s17 }
  0x36   :  { %p774_p11 = scmp.lt.u32.totalorder %s770_s21, %s964_s5 }
  0x38   :  { %p776_p12 = pnand %p774_p11, %p771_p10 }
  0x3a   :  { %779 = shalt.err (!%p776_p12)
}
  0x3b   :  { %s780_s1 = scalar_lea.vmem %s60_s17, 2048  ;;  %p785_p0 = scmp.lt.s32.totalorder %s60_s17, %s60_s17 }
  0x3c   :  { %p781_p13 = scmp.ne.s32.totalorder %s60_s17, %s780_s1  ;;  %p786_p1 = scmp.lt.s32.totalorder %s780_s1, %s780_s1 }
  0x3e   :  { %p787_p2 = por %p786_p1, %p785_p0 }
  0x40   :  { %p788_p3 = pnand %p787_p2, %p781_p13 }
  0x42   :  { %791 = shalt.err (!%p788_p3)
}
  0x43   :  { %s828_s3 = smov 128   ;;  %s829_s11 = smov 8  }
  0x44   :  { %65 = dma.hbm_to_vmem [thread:$0]  %s964_s5, 2048, %s60_s17, [#allocation9], %s828_s3, %s828_s3, %s829_s11  }
  0x45   :  { %814 = dma.done.wait [#allocation3], 64  }
  0x46   :  { %815 = vsyncadd [#allocation3], 4294967232 }
  0x47   :  { %816 = dma.done.wait [#allocation6], 3072  }
  0x48   :  { %817 = vsyncadd [#allocation6], 4294964224 }
  0x49   :  { %818 = dma.done.wait [#allocation9], 2048  }
  0x4a   :  { %819 = vsyncadd [#allocation9], 4294965248  ;;  %v830_v0 = vmov 0.0   ;;  %v678_v1 = vld [vmem:[#allocation5 + $0x40] sm:$0xff]   ;;  %v680_v3 = vld [vmem:[#allocation5 + $0x48] sm:$0xff]   ;;  %vm831_vm0 = vmmov 0  }
  0x4b   :  { %587 = vmatprep.subr.bf16.mxu1 %v830_v0  ;;  %v679_v2 = vld [vmem:[#allocation5] sm:$0xff]   ;;  %539 = vmatprep.subr.bf16.mxu0 %v678_v1  ;;  %v681_v4 = vld [vmem:[#allocation5 + $0x8] sm:$0xff]   ;;  %v682_v5 = vld [vmem:[#allocation5 + $0x50] sm:$0xff]   ;;  %v832_v32 = vmov 0.0|0.0   ;;  %vm384_vm1 = vcmask 1041408  }
  0x4c   :  { %540 = vmatpush3.bf16.msra.mxu0 %v679_v2  ;;  %v683_v6 = vld [vmem:[#allocation5 + $0x10] sm:$0xff]   ;;  %v684_v7 = vld [vmem:[#allocation5 + $0x58] sm:$0xff]   ;;  %v686_v9 = vld [vmem:[#allocation5 + $0x60] sm:$0xff]   ;;  %603 = vmatprep.mubr.msk.bf16.mxu1 %vm831_vm0, %v830_v0 }
  0x4d   :  { %541 = vmatprep.subr.bf16.mxu0 %v680_v3  ;;  %v685_v8 = vld [vmem:[#allocation5 + $0x18] sm:$0xff]   ;;  %v687_v10 = vld [vmem:[#allocation5 + $0x20] sm:$0xff]   ;;  %v688_v11 = vld [vmem:[#allocation5 + $0x68] sm:$0xff]  }
  0x4e   :  { %v511_v12 = vld.sshfl [vmem:[#allocation2] sm:$0x33 pattern:$0x76325410]  ;;  %v694_v14 = vld [vmem:[#allocation7] sm:$0xff]   ;;  %v689_v15 = vld [vmem:[#allocation5 + $0x28] sm:$0xff]  }
  0x4f   :  { %v90_v13 = vcombine.high %v511_v12, %v511_v12  ;;  %588 = vmatpush3.bf16.msra.mxu1 %v694_v14  ;;  %v695_v17 = vld [vmem:[#allocation7 + $0x8] sm:$0xff]   ;;  %v690_v18 = vld [vmem:[#allocation5 + $0x70] sm:$0xff]   ;;  %v692_v21 = vld [vmem:[#allocation5 + $0x78] sm:$0xff]   ;;  %v93_v24 = vpack.c.bf16 %v511_v12, %v511_v12 }
  0x50   :  { %542 = vmatpush3.bf16.msra.mxu0 %v681_v4  ;;  %589 = vmatprep.subr.bf16.mxu1 %v830_v0  ;;  %v691_v19 = vld [vmem:[#allocation5 + $0x30] sm:$0xff]   ;;  %v693_v22 = vld [vmem:[#allocation5 + $0x38] sm:$0xff]   ;;  %v698_v25 = vld [vmem:[#allocation7 + $0x20] sm:$0xff]  }
  0x51   :  { %543 = vmatprep.subr.bf16.mxu0 %v682_v5  ;;  %v94_v16 = vpack.c.bf16 %v90_v13, %v90_v13  ;;  %v696_v20 = vld [vmem:[#allocation7 + $0x10] sm:$0xff]   ;;  %v697_v23 = vld [vmem:[#allocation7 + $0x18] sm:$0xff]   ;;  %v699_v26 = vld [vmem:[#allocation7 + $0x28] sm:$0xff]  }
  0x52   :  { %v700_v27 = vld [vmem:[#allocation7 + $0x30] sm:$0xff]   ;;  %v701_v28 = vld [vmem:[#allocation7 + $0x38] sm:$0xff]   ;;  %v388_v29 = vld [vmem:[#allocation8] sm:$0xff] }
  0x53   :  { %262 = vmatprep.mubr.bf16.mxu0 %v94_v16  ;;  %590 = vmatpush3.bf16.msra.mxu1 %v695_v17  ;;  %v389_v30 = vld [vmem:[#allocation8 + $0x8] sm:$0xff]  ;;  %v390_v31 = vld [vmem:[#allocation8 + $0x10] sm:$0xff]  ;;  %v391_v34 = vld [vmem:[#allocation8 + $0x18] sm:$0xff] }
  0x54   :  { %544 = vmatpush3.bf16.msra.mxu0 %v683_v6  ;;  %591 = vmatprep.subr.bf16.mxu1 %v830_v0  ;;  %v643_v33 = vpack.c.bf16 %v389_v30, %v388_v29  ;;  %v646_v35 = vpack.c.bf16 %v391_v34, %v390_v31  ;;  %v392_v36 = vld [vmem:[#allocation8 + $0x20] sm:$0xff]  ;;  %v393_v37 = vld [vmem:[#allocation8 + $0x28] sm:$0xff]  ;;  %v394_v39 = vld [vmem:[#allocation8 + $0x30] sm:$0xff] }
  0x55   :  { %545 = vmatprep.subr.bf16.mxu0 %v684_v7  ;;  %v649_v38 = vpack.c.bf16 %v393_v37, %v392_v36  ;;  %v395_v40 = vld [vmem:[#allocation8 + $0x38] sm:$0xff]  ;;  %v396_v42 = vld [vmem:[#allocation8 + $0x40] sm:$0xff]  ;;  %v397_v43 = vld [vmem:[#allocation8 + $0x48] sm:$0xff] }
  0x56   :  { %v652_v41 = vpack.c.bf16 %v395_v40, %v394_v39  ;;  %v655_v44 = vpack.c.bf16 %v397_v43, %v396_v42  ;;  %v398_v45 = vld [vmem:[#allocation8 + $0x50] sm:$0xff]  ;;  %v399_v46 = vld [vmem:[#allocation8 + $0x58] sm:$0xff]  ;;  %v400_v48 = vld [vmem:[#allocation8 + $0x60] sm:$0xff] }
  0x57   :  { %592 = vmatpush3.bf16.msra.mxu1 %v696_v20  ;;  %v658_v47 = vpack.c.bf16 %v399_v46, %v398_v45  ;;  %v401_v49 = vld [vmem:[#allocation8 + $0x68] sm:$0xff]  ;;  %v512_v52 = vld [vmem:[%s961_s2] ss:$0 sm:$0xff]  ;;  %v402_v60 = vld [vmem:[#allocation8 + $0x70] sm:$0xff] }
  0x58   :  { %546 = vmatpush3.bf16.msra.mxu0 %v685_v8  ;;  %593 = vmatprep.subr.bf16.mxu1 %v830_v0  ;;  %v661_v50 = vpack.c.bf16 %v401_v49, %v400_v48  ;;  %v403_v61 = vld [vmem:[#allocation8 + $0x78] sm:$0xff] }
  0x59   :  { %547 = vmatprep.subr.bf16.mxu0 %v686_v9  ;;  %v664_v62 = vpack.c.bf16 %v403_v61, %v402_v60  ;;  %v529_v63 = vld [vmem:[%s963_s4] ss:$0 sm:$0xff]  ;;  %s833_s4 = smov [#allocation10]  }
  0x5a   :  { %v538_v8 = vld [vmem:[%s965_s6] ss:$0 sm:$0xff]  ;;  %s500_s30 = sshll.u32 %s833_s4, 4  ;;  %s501_s30 = int_to_ptr.vmem [resolvable:$true] %s500_s30 }
  0x5b   :  { %594 = vmatpush3.bf16.msra.mxu1 %v697_v23  ;;  %s792_s6 = scalar_lea.vmem %s501_s30, 32  ;;  %p797_p5 = scmp.lt.s32.totalorder %s501_s30, %s501_s30 }
  0x5c   :  { %548 = vmatpush3.bf16.msra.mxu0 %v687_v10  ;;  %595 = vmatprep.subr.bf16.mxu1 %v830_v0  ;;  %p793_p4 = scmp.ne.s32.totalorder %s501_s30, %s792_s6  ;;  %p798_p6 = scmp.lt.s32.totalorder %s792_s6, %s792_s6 }
  0x5d   :  { %549 = vmatprep.subr.bf16.mxu0 %v688_v11 }
  0x5e   :  { %p799_p7 = por %p798_p6, %p797_p5 }
  0x5f   :  { %596 = vmatpush3.bf16.msra.mxu1 %v698_v25 }
  0x60   :  { %550 = vmatpush3.bf16.msra.mxu0 %v689_v15  ;;  %597 = vmatprep.subr.bf16.mxu1 %v830_v0  ;;  %p800_p8 = pnand %p799_p7, %p793_p4 }
  0x61   :  { %551 = vmatprep.subr.bf16.mxu0 %v690_v18 }
  0x63   :  { %598 = vmatpush3.bf16.msra.mxu1 %v699_v26 }
  0x64   :  { %552 = vmatpush3.bf16.msra.mxu0 %v691_v19  ;;  %599 = vmatprep.subr.bf16.mxu1 %v830_v0 }
  0x65   :  { %553 = vmatprep.subr.bf16.mxu0 %v692_v21 }
  0x67   :  { %600 = vmatpush3.bf16.msra.mxu1 %v700_v27 }
  0x68   :  { %554 = vmatpush3.bf16.msra.mxu0 %v693_v22  ;;  %601 = vmatprep.subr.bf16.mxu1 %v830_v0 }
  0x69   :  { %642 = vmatprep.subr.bf16.mxu0 %v832_v32 }
  0x6b   :  { %263 = vmatmul.mubr.bf16.vlgmr.msra.gmra.mrb[0].mxu0 %v93_v24  ;;  %602 = vmatpush3.bf16.msra.mxu1 %v701_v28 }
  0x6c   :  { %639 = vmatprep.mubr.msk.f32.mxu0 %vm831_vm0, %v830_v0  ;;  %644 = vmatpush3.bf16.msra.mxu0 %v643_v33 }
  0x6d   :  { %645 = vmatprep.subr.bf16.mxu0 %v832_v32 }
  0x70   :  { %647 = vmatpush3.bf16.msra.mxu0 %v646_v35 }
  0x71   :  { %648 = vmatprep.subr.bf16.mxu0 %v832_v32 }
  0x74   :  { %650 = vmatpush3.bf16.msra.mxu0 %v649_v38 }
  0x75   :  { %651 = vmatprep.subr.bf16.mxu0 %v832_v32 }
  0x78   :  { %653 = vmatpush3.bf16.msra.mxu0 %v652_v41 }
  0x79   :  { %654 = vmatprep.subr.bf16.mxu0 %v832_v32 }
  0x7c   :  { %656 = vmatpush3.bf16.msra.mxu0 %v655_v44 }
  0x7d   :  { %657 = vmatprep.subr.bf16.mxu0 %v832_v32 }
  0x80   :  { %659 = vmatpush3.bf16.msra.mxu0 %v658_v47 }
  0x81   :  { %660 = vmatprep.subr.bf16.mxu0 %v832_v32 }
  0x84   :  { %662 = vmatpush3.bf16.msra.mxu0 %v661_v50 }
  0x85   :  { %663 = vmatprep.subr.bf16.mxu0 %v832_v32 }
  0x88   :  { %665 = vmatpush3.bf16.msra.mxu0 %v664_v62 }
 0x13e   :  { %v555_v51 = vpop.f32.mrb[0].mxu0 }
 0x13f   :  { %v556_v53 = vpop.f32.mrb[1].mxu0 }
 0x140   :  { %v557_v54 = vadd.f32 %v556_v53, %v555_v51  ;;  %v558_v55 = vpop.f32.mrb[2].mxu0 }
 0x141   :  { %v559_v56 = vpop.f32.mrb[3].mxu0 }
 0x142   :  { %v265_v57 = vadd.f32 %v557_v54, %v512_v52 }
 0x144   :  { %v270_v58 = vmax.f32 %v265_v57, 0.0 }
 0x146   :  { %v271_v59 = vpack.c.bf16 %v270_v58, %v270_v58 }
 0x148   :  { %604 = vmatmul.mubr.bf16.vlgmr.msra.gmra.mrb[0].mxu1 %v271_v59 }
 0x21b   :  { %v377_v0 = vpop.f32.mrb[0].mxu1 }
 0x21c   :  { %v378_v1 = vadd.f32 %v529_v63, %v377_v0  ;;  %v605_v2 = vpop.f32.mrb[1].mxu1 }
 0x21d   :  { %v380_v3 = vpop.f32.mrb[2].mxu1 }
 0x21e   :  { %v606_v4 = vpop.f32.mrb[3].mxu1  ;;  %640 = vmatmul.mubr.f32.vlgmr.msra.gmra.mrb[4].mxu0 %v378_v1  ;;  %v383_v5 = vmul.f32 %v378_v1, %v378_v1 }
 0x220   :  { %v385_v6 = vsel %vm384_vm1, %v383_v5, 0.0 }
 0x221   :  { %386 = vadd.xlane.f32.xlu0 %v385_v6 }
 0x2ae   :  { %v387_v7 = vpop.xlane.xlu0 %386 }
 0x2af   :  { %v481_v10 = vadd.f32 %v538_v8, %v387_v7 }
 0x2f1   :  { %v470_v9 = vpop.f32.mrb[4].mxu0 }
 0x2f2   :  { %v482_v11 = vmul.f32 2.0, %v470_v9  ;;  %v641_v12 = vpop.f32.mrb[5].mxu0 }
 0x2f4   :  { %v483_v13 = vsub.f32 %v481_v10, %v482_v11 }
 0x2f6   :  { %v484_v14 = vmax.f32 %v483_v13, 0.0 }
 0x2f8   :  { %702 = vrsqrt.f32 %v484_v14  ;;  %vm487_vm2 = vcmp.eq.f32.partialorder %v484_v14, inf  ;;  %v490_v17 = vand.u32 2147483648, %v484_v14  ;;  %vm489_vm3 = vcmp.eq.f32.partialorder %v484_v14, 0.0 }
 0x302   :  { %v703_v15 = vpop.eup %702 }
 0x303   :  { %v486_v16 = vmul.f32 %v703_v15, %v484_v14 }
 0x305   :  { %v488_v18 = vsel %vm487_vm2, %v484_v14, %v486_v16 }
 0x306   :  { %v491_v19 = vsel %vm489_vm3, %v490_v17, %v488_v18 }
 0x307   :  { %v492_v20 = vmul.f32 -100.0, %v491_v19 }
 0x309   :  { %493 = vst [vmem:[#allocation10] sm:$0x3] %v492_v20 }
 0x30a   :  { %803 = shalt.err (!%p800_p8)
}
 0x30b   :  { %s804_s10 = scalar_lea.hbm %s966_s7, 32 }
 0x30c   :  { %p805_p9 = scmp.ne.s32.totalorder %s966_s7, %s804_s10  ;;  %p808_p10 = scmp.lt.u32.totalorder %s804_s10, %s966_s7 }
 0x30e   :  { %p810_p11 = pnand %p808_p10, %p805_p9 }
 0x310   :  { %813 = shalt.err (!%p810_p11)
}
 0x311   :  { %503 = dma.vmem_to_hbm [thread:$0]  %s501_s30, 32, %s966_s7, [#allocation4]  }
 0x312   :  { %820 = dma.done.wait [#allocation4], 32  }
 0x313   :  { %821 = vsyncadd [#allocation4], 4294967264 }
 0x314   :  { %507 = vsyncpa [#allocation3], 1 }
 0x315   :  { %508 = vsyncpa [#allocation6], 1 }
 0x316   :  { %509 = vsyncpa [#allocation9], 1 }
 0x317   :  { %510 = vsyncpa [#allocation4], 1 }

</bundles_post_ra>
